<compile_context>
chip_gen: v6e
topology: v6e:2x2x1
jax: 0.10.0
libtpu: 0.0.40
codegen_flags: <defaults>
</compile_context>

<pallas_src>
import jax
import jax.numpy as jnp
from jax.experimental import pallas as pl
from jax.experimental.pallas import tpu as pltpu


def _se_kernel(x_ref, w1t_ref, b1_ref, w2t_ref, b2_ref, o_ref):
    # x_ref: (Nb, C, HW) block for the current batch-block (HW on lanes).
    x = x_ref[...]                                              # (Nb, C, HW) f32
    # Squeeze: global average pool over spatial positions (cross-lane reduce).
    mean = jnp.mean(x, axis=-1)                                 # (Nb, C)
    # Excite: 1x1 convs == tiny dense layers, batched over the Nb pooled rows.
    h = jnp.dot(mean, w1t_ref[...],
                preferred_element_type=jnp.float32) + b1_ref[...]   # (Nb, Cr)
    h = jnp.maximum(h, 0.0)                                     # ReLU
    g = jnp.dot(h, w2t_ref[...],
                preferred_element_type=jnp.float32) + b2_ref[...]   # (Nb, C)
    gate = jnp.exp(jax.nn.sigmoid(g))                           # exp(sigmoid(.))
    # Scale: broadcast the per-(n, c) gate along the lane (HW) axis — hoisted,
    # computed exactly once per block.
    o_ref[...] = (x * gate[:, :, None]).astype(o_ref.dtype)


def _pick_batch_block(n, per_batch_bytes, target_bytes=2 * 1024 * 1024):
    """Largest Nb that divides N, keeps the block <= target_bytes, and leaves
    >= 2 grid steps when N >= 2 (so v7x megacore still has work to shard)."""
    nb = 1
    for d in range(1, n + 1):
        if n % d:
            continue
        if d * per_batch_bytes > target_bytes:
            break
        if n // d >= 2 or n == 1:
            nb = d
    return nb


def se_block_pallas(x_nchw, w1, b1, w2, b2):
    """x_nchw: (N, C, H, W). w1: (Cr, C), b1: (Cr,), w2: (C, Cr), b2: (C,)."""
    N, C, H, W = x_nchw.shape
    Cr = w1.shape[0]
    HW = H * W

    # Free, contiguous reshape (no transpose): NCHW -> (N, C, HW).
    x_r = x_nchw.reshape(N, C, HW)
    # Transposed weights for right-multiplication of (Nb, C) pooled rows.
    w1t = jnp.transpose(w1)            # (C, Cr)
    w2t = jnp.transpose(w2)            # (Cr, C)
    b1r = b1.reshape(1, Cr)
    b2r = b2.reshape(1, C)

    per_batch_bytes = C * HW * x_nchw.dtype.itemsize
    nb = _pick_batch_block(N, per_batch_bytes)
    grid = (N // nb,)

    out = pl.pallas_call(
        _se_kernel,
        out_shape=jax.ShapeDtypeStruct((N, C, HW), x_nchw.dtype),
        grid_spec=pltpu.PrefetchScalarGridSpec(
            num_scalar_prefetch=0,
            grid=grid,
            in_specs=[
                pl.BlockSpec((nb, C, HW), lambda n: (n, 0, 0)),
                pl.BlockSpec((C, Cr), lambda n: (0, 0)),
                pl.BlockSpec((1, Cr), lambda n: (0, 0)),
                pl.BlockSpec((Cr, C), lambda n: (0, 0)),
                pl.BlockSpec((1, C), lambda n: (0, 0)),
            ],
            out_specs=pl.BlockSpec((nb, C, HW), lambda n: (n, 0, 0)),
        ),
        # Output reuses x's buffer when donation allows (no extra HBM alloc).
        input_output_aliases={0: 0},
        compiler_params=pltpu.CompilerParams(
            dimension_semantics=("parallel",),
            vmem_limit_bytes=32 * 1024 * 1024,
        ),
    )(x_r, w1t, b1r, w2t, b2r)

    # Free reshape back to NCHW (same contiguous layout).
    return out.reshape(N, C, H, W)


def se_block_ref(x, w1, b1, w2, b2):
    """Pure-JAX reference matching the PyTorch module."""
    s = jnp.mean(x, axis=(2, 3))                                   # (N, C)
    h = jnp.maximum(s @ w1.T + b1, 0.0)                            # (N, Cr)
    g = jax.nn.sigmoid(h @ w2.T + b2)                              # (N, C)
    return x * jnp.exp(g)[:, :, None, None]


if __name__ == "__main__":
    # Small shapes consistent with the module: channel must be >= reduct_ratio.
    N, C, H, W = 2, 32, 16, 16
    reduct_ratio = 16
    Cr = C // reduct_ratio

    key = jax.random.PRNGKey(0)
    kx, kw1, kb1, kw2, kb2 = jax.random.split(key, 5)

    x = jax.random.normal(kx, (N, C, H, W), dtype=jnp.float32)
    # 1x1 conv weights (kernel dims squeezed), deterministic init.
    w1 = jax.random.normal(kw1, (Cr, C), dtype=jnp.float32) * 0.1
    b1 = jax.random.normal(kb1, (Cr,), dtype=jnp.float32) * 0.1
    w2 = jax.random.normal(kw2, (C, Cr), dtype=jnp.float32) * 0.1
    b2 = jax.random.normal(kb2, (C,), dtype=jnp.float32) * 0.1

    out = jax.block_until_ready(se_block_pallas(x, w1, b1, w2, b2))
    ref = jax.block_until_ready(se_block_ref(x, w1, b1, w2, b2))

    assert out.shape == (N, C, H, W)
    assert jnp.allclose(out, ref, atol=1e-5, rtol=1e-5), "mismatch vs reference"
    print("KERNEL_OK")
</pallas_src>

<mosaic_0001>
module attributes {stable_mosaic.version = 11 : i64} {
  func.func @_se_kernel(%arg0: i32, %arg1: memref<1x32x256xf32, #tpu.memory_space<vmem>>, %arg2: memref<32x2xf32, #tpu.memory_space<vmem>>, %arg3: memref<1x2xf32, #tpu.memory_space<vmem>>, %arg4: memref<2x32xf32, #tpu.memory_space<vmem>>, %arg5: memref<1x32xf32, #tpu.memory_space<vmem>>, %arg6: memref<1x32x256xf32, #tpu.memory_space<vmem>>) attributes {dimension_semantics = [#tpu.dimension_semantics<parallel>], iteration_bounds = array<i64: 2>, scalar_prefetch = 0 : i64, scratch_operands = 0 : i64, tpu.core_type = #tpu.core_type<tc>, window_params = [{transform_indices = @transform_0, window_bounds = array<i64: 1, 32, 256>}, {pipeline_mode = #tpu.pipeline_mode<synchronous>, transform_indices = @transform_1, window_bounds = array<i64: 32, 2>}, {pipeline_mode = #tpu.pipeline_mode<synchronous>, transform_indices = @transform_2, window_bounds = array<i64: 1, 2>}, {pipeline_mode = #tpu.pipeline_mode<synchronous>, transform_indices = @transform_3, window_bounds = array<i64: 2, 32>}, {pipeline_mode = #tpu.pipeline_mode<synchronous>, transform_indices = @transform_4, window_bounds = array<i64: 1, 32>}, {transform_indices = @transform_5, window_bounds = array<i64: 1, 32, 256>}]} {
    %c0 = arith.constant 0 : index
    %c0_0 = arith.constant 0 : index
    %c0_1 = arith.constant 0 : index
    %0 = vector.load %arg1[%c0, %c0_0, %c0_1] : memref<1x32x256xf32, #tpu.memory_space<vmem>>, vector<1x32x256xf32>
    %cst = arith.constant dense<0.000000e+00> : vector<1x32xf32>
    %1 = vector.multi_reduction <add>, %0, %cst [2] : vector<1x32x256xf32> to vector<1x32xf32>
    %cst_2 = arith.constant 2.560000e+02 : f32
    %2 = vector.broadcast %cst_2 : f32 to vector<1x32xf32>
    %3 = arith.divf %1, %2 : vector<1x32xf32>
    %c0_3 = arith.constant 0 : index
    %c0_4 = arith.constant 0 : index
    %4 = vector.load %arg2[%c0_3, %c0_4] : memref<32x2xf32, #tpu.memory_space<vmem>>, vector<32x2xf32>
    %cst_5 = arith.constant dense<0.000000e+00> : vector<1x2xf32>
    %5 = tpu.matmul %3, %4, %cst_5 {dimension_numbers = #tpu.dot_dimension_numbers<[1], [0], [0], [1], [0, 0, 1, 1], [], []>} : vector<1x32xf32>, vector<32x2xf32>, vector<1x2xf32> -> vector<1x2xf32>
    %c0_6 = arith.constant 0 : index
    %c0_7 = arith.constant 0 : index
    %6 = vector.load %arg3[%c0_6, %c0_7] : memref<1x2xf32, #tpu.memory_space<vmem>>, vector<1x2xf32>
    %7 = arith.addf %5, %6 : vector<1x2xf32>
    %cst_8 = arith.constant 0.000000e+00 : f32
    %8 = vector.broadcast %cst_8 : f32 to vector<1x2xf32>
    %9 = arith.maximumf %7, %8 : vector<1x2xf32>
    %c0_9 = arith.constant 0 : index
    %c0_10 = arith.constant 0 : index
    %10 = vector.load %arg4[%c0_9, %c0_10] : memref<2x32xf32, #tpu.memory_space<vmem>>, vector<2x32xf32>
    %cst_11 = arith.constant dense<0.000000e+00> : vector<1x32xf32>
    %11 = tpu.matmul %9, %10, %cst_11 {dimension_numbers = #tpu.dot_dimension_numbers<[1], [0], [0], [1], [0, 0, 1, 1], [], []>} : vector<1x2xf32>, vector<2x32xf32>, vector<1x32xf32> -> vector<1x32xf32>
    %c0_12 = arith.constant 0 : index
    %c0_13 = arith.constant 0 : index
    %12 = vector.load %arg5[%c0_12, %c0_13] : memref<1x32xf32, #tpu.memory_space<vmem>>, vector<1x32xf32>
    %13 = arith.addf %11, %12 : vector<1x32xf32>
    %14 = arith.negf %13 : vector<1x32xf32>
    %15 = math.exp %14 : vector<1x32xf32>
    %cst_14 = arith.constant 1.000000e+00 : f32
    %16 = vector.broadcast %cst_14 : f32 to vector<1x32xf32>
    %17 = arith.addf %16, %15 : vector<1x32xf32>
    %18 = arith.divf %16, %17 : vector<1x32xf32>
    %19 = math.exp %18 : vector<1x32xf32>
    %20 = vector.shape_cast %19 : vector<1x32xf32> to vector<1x32x1xf32>
    %21 = vector.broadcast %20 : vector<1x32x1xf32> to vector<1x32x256xf32>
    %22 = arith.mulf %0, %21 : vector<1x32x256xf32>
    %c0_15 = arith.constant 0 : index
    %c0_16 = arith.constant 0 : index
    %c0_17 = arith.constant 0 : index
    %23 = vector.load %arg6[%c0_15, %c0_16, %c0_17] : memref<1x32x256xf32, #tpu.memory_space<vmem>>, vector<1x32x256xf32>
    tpu.vector_store %arg6[%c0_15, %c0_16, %c0_17], %22 {strides = array<i32>} : memref<1x32x256xf32, #tpu.memory_space<vmem>>, vector<1x32x256xf32>,
    return
  }
  func.func @transform_0(%arg0: i32) -> (i32, i32, i32) {
    %c0_i32 = arith.constant 0 : i32
    %c0_i32_0 = arith.constant 0 : i32
    %c0_i32_1 = arith.constant 0 : i32
    return %arg0, %c0_i32, %c0_i32_0 : i32, i32, i32
  }
  func.func @transform_1(%arg0: i32) -> (i32, i32) {
    %c0_i32 = arith.constant 0 : i32
    %c0_i32_0 = arith.constant 0 : i32
    %c0_i32_1 = arith.constant 0 : i32
    return %c0_i32, %c0_i32_0 : i32, i32
  }
  func.func @transform_2(%arg0: i32) -> (i32, i32) {
    %c0_i32 = arith.constant 0 : i32
    %c0_i32_0 = arith.constant 0 : i32
    %c0_i32_1 = arith.constant 0 : i32
    return %c0_i32, %c0_i32_0 : i32, i32
  }
  func.func @transform_3(%arg0: i32) -> (i32, i32) {
    %c0_i32 = arith.constant 0 : i32
    %c0_i32_0 = arith.constant 0 : i32
    %c0_i32_1 = arith.constant 0 : i32
    return %c0_i32, %c0_i32_0 : i32, i32
  }
  func.func @transform_4(%arg0: i32) -> (i32, i32) {
    %c0_i32 = arith.constant 0 : i32
    %c0_i32_0 = arith.constant 0 : i32
    %c0_i32_1 = arith.constant 0 : i32
    return %c0_i32, %c0_i32_0 : i32, i32
  }
  func.func @transform_5(%arg0: i32) -> (i32, i32, i32) {
    %c0_i32 = arith.constant 0 : i32
    %c0_i32_0 = arith.constant 0 : i32
    %c0_i32_1 = arith.constant 0 : i32
    return %arg0, %c0_i32, %c0_i32_0 : i32, i32, i32
  }
}

</mosaic_0001>

<bundles_post_ra>
// kernel: tpu_custom_call.1
= control target key start
LH: loop header
LB: loop body
LE: loop exit
PB: predicated region body
PF: predicated region fallthrough
CT: control target
= control target key end

     0   :  { %10 = vsyncpa [#allocation3], 0  ;;  %s1032_s0 = inlined_call_operand.hbm [shape: f32[2,32,256], index: 0, kind: input, shape index: {}, may-alias: {0,5}]   ;;  %s1033_s1 = inlined_call_operand.vmem [shape: f32[32,2], index: 1, kind: input, shape index: {}]   ;;  %s1034_s2 = inlined_call_operand.vmem [shape: f32[1,2], index: 2, kind: input, shape index: {}]   ;;  %s1035_s3 = inlined_call_operand.vmem [shape: f32[2,32], index: 3, kind: input, shape index: {}]   ;;  %s1036_s4 = inlined_call_operand.vmem [shape: f32[1,32], index: 4, kind: input, shape index: {}]   ;;  %s1037_s5 = inlined_call_operand.hbm [shape: f32[2,32,256], index: 5, kind: output, shape index: {}, may-alias: {0,5}]  }
   0x1   :  { %12 = vsyncpa [#allocation3 + $0x1], 0 }
   0x2   :  { %13 = vsyncpa [#allocation4], 0 }
   0x3   :  { %15 = vsyncpa [#allocation4 + $0x1], 0  ;;  %s821_s18 = smov 0   ;;  %s823_s19 = smov 0  }
   0x4   :  { %s825_s20 = smov 0   ;;  %s827_s21 = smov 0  }
   0x5 LB: > { %s842_s22 = sadd.s32 4294967295, %s781_s21   ;;  %s588_s23 = sadd.s32 4294967294, %s781_s21   ;;  %s781_s21 = sphi %s827_s21, %s1052_s21   ;;  %s777_s20 = sphi %s825_s20, %s1051_s20   ;;  %s773_s19 = sphi %s823_s19, %s1050_s19   ;;  %s769_s18 = sphi %s821_s18, %s1049_s18  }
   0x6   : > { %s846_s24 = sadd.s32 1, %s781_s21   ;;  %s28_s25 = sadd.s32 1, %s777_s20 }
   0x7   : > { %s25_s26 = ssub.s32 %s781_s21, %s846_s24  ;;  %p35_p0 = scmp.ne.s32.totalorder %s777_s20, %s773_s19 }
   0x8   : > { %p26_p1 = scmp.eq.s32.totalorder %s25_s26, 0  ;;  %p36_p2 = scmp.eq.s32.totalorder %s781_s21, 0 }
   0x9   : > { %p41_p3 = scmp.ne.s32.totalorder %s773_s19, %s769_s18  ;;  %p42_p4 = scmp.eq.s32.totalorder %s842_s22, 0 }
   0xa   : > { %s858_s27 = scalar_select %p26_p1, %s777_s20, %s28_s25  }
   0xb   : > { %p860_p5 = por %p36_p2, %p35_p0  ;;  %p864_p6 = por %p42_p4, %p41_p3 }
   0xc   : > { %p149_p7 = scmp.eq.s32.totalorder %s842_s22, 1  ;;  %p155_p8 = scmp.eq.s32.totalorder %s588_s23, 1 }
   0xd   : > { %s1041_s29 = scalar_select %p864_p6, 1, 0 }
   0xe   : > { %p643_p10 = scmp.lt.s32.totalorder %s781_s21, 2  ;;  %p871_p11 = por %p149_p7, %p35_p0 }
   0xf   : > { %p875_p12 = por %p155_p8, %p41_p3  ;;  %s187_s7 = sand.u32 1, %s777_s20  }
  0x10   : > { %s1042_s30 = scalar_select %p871_p11, 1, 0 }
  0x11   : > { %s1043_s6 = scalar_select %p875_p12, 1, 0 }
  0x12   : > { %s606_s8 = sshll.u32 %s781_s21, 10  ;;  %s591_s9 = sshll.u32 %s187_s7, 6 }
  0x13   : > { %s884_s12 = scalar_lea.hbm %s1032_s0, %s606_s8  ;;  %s191_s13 = scalar_lea.vmem [#allocation2], %s591_s9 }
  0x14   : > { %s198_s14 = sshll.u32 %s191_s13, 4  ;;  %p888_p13 = pnand %p643_p10, %p860_p5  ;;  %s892_s14 = int_to_ptr.vmem [resolvable:$true] %s198_s14 }
  0x15   : > { %s894_s16 = scalar_lea.sflag [#allocation3], %s187_s7  ;;  %s689_s17 = scalar_lea.hbm %s884_s12, 1024 }
  0x16   : > { %p690_p0 = scmp.ne.s32.totalorder %s884_s12, %s689_s17  ;;  %p691_p1 = pneg %p888_p13 }
  0x17   : > { %s694_s26 = scalar_lea.hbm %s1032_s0, 2048  ;;  %p695_p4 = scmp.lt.s32.totalorder %s884_s12, %s1032_s0 }
  0x18   : > { %p692_p2 = pnand %p691_p1, %p690_p0  ;;  %p696_p5 = scmp.lt.s32.totalorder %s694_s26, %s689_s17 }
  0x1a   : > { %p693_p3 = pneg %p692_p2  ;;  %p697_p7 = por %p696_p5, %p695_p4 }
  0x1c   : > { %p698_p8 = pnand %p697_p7, %p693_p3 }
  0x1e   : > { %701 = shalt.err (!%p698_p8)
}
  0x1f   : > { %s702_s7 = scalar_lea.vmem %s892_s14, 1024  ;;  %s783_s9 = smov [#allocation2]  }
  0x20   : > { %p703_p10 = scmp.ne.s32.totalorder %s892_s14, %s702_s7  ;;  %s707_s10 = sshll.u32 %s783_s9, 4  ;;  %s708_s10 = int_to_ptr.vmem [resolvable:$false] %s707_s10 }
  0x21   : > { %s709_s11 = scalar_lea.vmem %s708_s10, 2048  ;;  %p710_p2 = scmp.lt.s32.totalorder %s892_s14, %s708_s10 }
  0x22   : > { %p705_p9 = pnand %p703_p10, %p691_p1  ;;  %p711_p12 = scmp.lt.s32.totalorder %s709_s11, %s702_s7 }
  0x24   : > { %p706_p0 = pneg %p705_p9  ;;  %p712_p11 = por %p711_p12, %p710_p2 }
  0x26   : > { %p713_p6 = pnand %p712_p11, %p706_p0 }
  0x28   : > { %716 = shalt.err (!%p713_p6)
}
  0x29   : > { %s784_s13 = smov 256   ;;  %s785_s17 = smov 16  }
  0x2a   : > { %638 = dma.hbm_to_vmem [thread:$0]  (!%p888_p13), %s884_s12, 1024, %s892_s14, %s894_s16, %s784_s13, %s784_s13, %s785_s17  }
  0x2b   : > { %p594_p9 = scmp.ge.s32.totalorder %s781_s21, 1  ;;  %p206_p1 = scmp.lt.s32.totalorder %s781_s21, 3 }
  0x2d   : > { %p207_p3 = pnand %p594_p9, %p206_p1 }
  0x2e   : > { %s918_s23 = sand.u32 (!%p207_p3), 1, %s773_s19   ;;  %p1045_p6 = scmp.ne.s32.totalorder (!%p207_p3), %s1041_s29, 0 }
  0x2f   : > { %210 = sbr.rel (%p207_p3) target bundleno = 786 (0x312), region = 40  ;;  %s595_s25 = sshll.u32 (!%p207_p3), %s918_s23, 6 }
  0x30   : > { %s213_s26 = scalar_lea.sflag (!%p207_p3), [#allocation3], %s918_s23  ;;  %s216_s28 = scalar_lea.vmem (!%p207_p3), [#allocation2], %s595_s25 }
  0x34   : > { %760 = dma.done.wait (%p1045_p6), %s213_s26, 1024  }
  0x35   : > { %762 = vsyncadd (%p1045_p6), %s213_s26, 4294966272  ;;  %v928_v0 = vld [vmem:[%s216_s28] sm:$0xff]  ;;  %v930_v1 = vld [vmem:[%s216_s28 + $0x8] sm:$0xff]  ;;  %v786_v12 = vmov 0.0   ;;  %vm787_vm0 = vmmov 0   ;;  %v277_v17 = vlaneseq  ;;  %vm288_vm1 = vcmask 130112  }
  0x36   : > { %v932_v2 = vld [vmem:[%s216_s28 + $0x20] sm:$0xff]  ;;  %v251_v3 = vadd.f32 %v930_v1, %v928_v0  ;;  %v936_v4 = vld [vmem:[%s216_s28 + $0x28] sm:$0xff]  ;;  %v938_v5 = vld [vmem:[%s216_s28 + $0x10] sm:$0xff]  ;;  %615 = vmatprep.subr.mxu0 %v786_v12  ;;  %626 = vmatprep.subr.mxu1 %v786_v12  ;;  %vm295_vm2 = vcmask 195712   ;;  %vm302_vm3 = vcmask 261312   ;;  %vm304_vm4 = vcmask 261120  }
  0x37   : > { %v940_v6 = vld [vmem:[%s216_s28 + $0x18] sm:$0xff]  ;;  %v257_v7 = vadd.f32 %v936_v4, %v932_v2  ;;  %v944_v8 = vld [vmem:[%s216_s28 + $0x30] sm:$0xff]  ;;  %v269_v15 = vld [vmem:[%s1033_s1 + $0x8] sm:$0xff]  ;;  %623 = vmatprep.mubr.msk.f32.mxu0 %vm787_vm0, %v786_v12  ;;  %628 = vmatprep.mubr.msk.f32.mxu1 %vm787_vm0, %v786_v12  ;;  %v278_v18 = vand.u32 127, %v277_v17  ;;  %v280_v19 = vshrl.u32 %v277_v17, 7  ;;  %vm384_vm5 = vcmask 1041408  }
  0x38   : > { %v946_v9 = vld [vmem:[%s216_s28 + $0x38] sm:$0xff]  ;;  %252 = vadd.xlane.f32.xlu0 %v251_v3  ;;  %v254_v10 = vadd.f32 %v940_v6, %v938_v5  ;;  %v270_v14 = vld [vmem:[%s1033_s1 + $0x10] sm:$0xff]  ;;  %v268_v16 = vld [vmem:[%s1033_s1] sm:$0xff]  ;;  %vm380_vm6 = vcmask 15360   ;;  %s242_s29 = scalar_lea.vmem [#allocation5], %s595_s25  ;;  %s607_s14 = sshll.u32 %s842_s22, 10 }
  0x39   : > { %258 = vadd.xlane.f32.xlu1 %v257_v7  ;;  %v260_v11 = vadd.f32 %v946_v9, %v944_v8  ;;  %v271_v13 = vld [vmem:[%s1033_s1 + $0x18] sm:$0xff]  ;;  %v283_v20 = vadd.s32 4294967288, %v278_v18  ;;  %v290_v22 = vadd.s32 4294967280, %v278_v18  ;;  %v297_v23 = vadd.s32 4294967272, %v278_v18  ;;  %v378_v42 = vld [vmem:[%s1035_s3] sm:$0x3]  ;;  %s987_s16 = scalar_lea.hbm %s1037_s5, %s607_s14 }
  0x3a   : > { %616 = vmatpush3.msra.mxu0 %v271_v13  ;;  %v281_v25 = vsub.s32 %v278_v18, %v280_v19  ;;  %627 = vmatpush3.msk.msra.mxu1 %vm384_vm5, %v378_v42  ;;  %v272_v43 = vld [vmem:[%s1034_s2] sm:$0x1]  ;;  %v468_v57 = vsub.s32 0, %v280_v19  ;;  %s515_s12 = sshll.u32 %s242_s29, 4  ;;  %s502_s22 = scalar_lea.sflag [#allocation4], %s918_s23  ;;  %s982_s12 = int_to_ptr.vmem [resolvable:$true] %s515_s12 }
  0x3b   : > { %617 = vmatprep.subr.mxu0 %v786_v12  ;;  %v286_v27 = vsub.s32 %v283_v20, %v280_v19  ;;  %v293_v28 = vsub.s32 %v290_v22, %v280_v19  ;;  %v300_v31 = vsub.s32 %v297_v23, %v280_v19  ;;  %v379_v48 = vld [vmem:[%s1036_s4] sm:$0x1]  ;;  %s717_s8 = scalar_lea.vmem %s982_s12, 1024  ;;  %p1046_p12 = scmp.ne.s32.totalorder %s1042_s30, 0 }
  0x3c   : > { %255 = vadd.xlane.f32.xlu0 %v254_v10  ;;  %618 = vmatpush3.msra.mxu0 %v270_v14  ;;  %p718_p11 = scmp.ne.s32.totalorder %s982_s12, %s717_s8  ;;  %s788_s7 = smov [#allocation5]  }
  0x3d   : > { %261 = vadd.xlane.f32.xlu1 %v260_v11  ;;  %619 = vmatprep.subr.mxu0 %v786_v12  ;;  %s721_s9 = sshll.u32 %s788_s7, 4  ;;  %s722_s9 = int_to_ptr.vmem [resolvable:$false] %s721_s9 }
  0x3e   : > { %620 = vmatpush3.msra.mxu0 %v269_v15  ;;  %p719_p13 = pnand %p718_p11, %p1046_p12  ;;  %s723_s10 = scalar_lea.vmem %s722_s9, 2048 }
  0x3f   : > { %621 = vmatprep.subr.mxu0 %v786_v12  ;;  %p724_p5 = scmp.lt.s32.totalorder %s982_s12, %s722_s9  ;;  %p725_p7 = scmp.lt.s32.totalorder %s723_s10, %s717_s8 }
  0x40   : > { %622 = vmatpush3.msra.mxu0 %v268_v16  ;;  %p720_p4 = pneg %p719_p13 }
  0x41   : > { %p726_p8 = por %p725_p7, %p724_p5 }
  0x43   : > { %p727_p10 = pnand %p726_p8, %p720_p4 }
  0xc1   : > { %v253_v21 = vpop.xlane.xlu0 %252 }
  0xc2   : > { %v259_v24 = vpop.xlane.xlu1 %258  ;;  %v264_v26 = vmul.f32 0.00390625, %v253_v21 }
  0xc3   : > { %v266_v29 = vmul.f32 0.00390625, %v259_v24 }
  0xc4   : > { %v282_v35 = vrot.slane %v264_v26, %v281_v25 }
  0xc5   : > { %v256_v30 = vpop.xlane.xlu0 %255  ;;  %v294_v37 = vrot.slane %v266_v29, %v293_v28 }
  0xc6   : > { %v265_v32 = vmul.f32 0.00390625, %v256_v30  ;;  %v262_v33 = vpop.xlane.xlu1 %261 }
  0xc7   : > { %v267_v34 = vmul.f32 0.00390625, %v262_v33 }
  0xc8   : > { %v287_v36 = vrot.slane %v265_v32, %v286_v27 }
  0xc9   : > { %v301_v38 = vrot.slane %v267_v34, %v300_v31 }
  0xca   : > { %v289_v39 = vsel %vm288_vm1, %v287_v36, %v282_v35 }
  0xcb   : > { %v296_v40 = vsel %vm295_vm2, %v294_v37, %v289_v39 }
  0xcc   : > { %v303_v41 = vsel %vm302_vm3, %v301_v38, %v296_v40 }
  0xcd   : > { %624 = vmatmul.mubr.msk.f32.vlgmr.msra.gmra.mxu0 %vm304_vm4, %v303_v41 }
 0x18d   : > { %v373_v44 = vpop.f32.mrf.mxu0 }
 0x18e   : > { %v374_v45 = vadd.f32 %v373_v44, %v272_v43 }
 0x18f   : > { %v625_v46 = vpop.f32.mrf.mxu0 }
 0x190   : > { %v377_v47 = vmax.f32 %v374_v45, 0.0 }
 0x192   : > { %629 = vmatmul.mubr.msk.f32.vlgmr.msra.gmra.mxu1 %vm380_vm6, %v377_v47 }
 0x252   : > { %v454_v49 = vpop.f32.mrf.mxu1 }
 0x253   : > { %v455_v50 = vadd.f32 %v454_v49, %v379_v48 }
 0x254   : > { %v630_v51 = vpop.f32.mrf.mxu1 }
 0x255   : > { %v600_v52 = vmul.f32 -1.442695, %v455_v50 }
 0x257   : > { %683 = vpow2.f32 %v600_v52 }
 0x264   : > { %v684_v53 = vpop.eup %683 }
 0x265   : > { %v461_v54 = vadd.f32 1.0, %v684_v53 }
 0x267   : > { %685 = vrcp.f32 %v461_v54 }
 0x274   : > { %v686_v55 = vpop.eup %685 }
 0x275   : > { %v464_v56 = vmul.f32 1.442695, %v686_v55 }
 0x277   : > { %687 = vpow2.f32 %v464_v56 }
 0x284   : > { %v688_v58 = vpop.eup %687 }
 0x285   : > { %v469_v59 = vrot.slane %v688_v58, %v468_v57 }
 0x287   : > { %475 = vbcast.lane.b32.xlu1 %v469_v59, 264  ;;  %471 = vbcast.lane.b32.xlu0 %v469_v59, 256 }
 0x28b   : > { %479 = vbcast.lane.b32.xlu1 %v469_v59, 272 }
 0x28f   : > { %483 = vbcast.lane.b32.xlu1 %v469_v59, 280 }
 0x2f9   : > { %v476_v60 = vpop.permute.xlu1 %475  ;;  %v472_v61 = vpop.permute.xlu0 %471 }
 0x2fa   : > { %v487_v62 = vmul.f32 %v476_v60, %v938_v5  ;;  %v488_v63 = vmul.f32 %v476_v60, %v940_v6  ;;  %v485_v3 = vmul.f32 %v472_v61, %v928_v0  ;;  %v486_v7 = vmul.f32 %v472_v61, %v930_v1 }
 0x2fc   : > { %495 = vst [vmem:[%s242_s29 + $0x10] sm:$0xff] %v487_v62  ;;  %496 = vst [vmem:[%s242_s29 + $0x18] sm:$0xff] %v488_v63 }
 0x2fd   : > { %493 = vst [vmem:[%s242_s29] sm:$0xff] %v485_v3  ;;  %494 = vst [vmem:[%s242_s29 + $0x8] sm:$0xff] %v486_v7  ;;  %v480_v10 = vpop.permute.xlu1 %479 }
 0x2fe   : > { %v489_v11 = vmul.f32 %v480_v10, %v932_v2  ;;  %v490_v5 = vmul.f32 %v480_v10, %v936_v4 }
 0x300   : > { %497 = vst [vmem:[%s242_s29 + $0x20] sm:$0xff] %v489_v11  ;;  %498 = vst [vmem:[%s242_s29 + $0x28] sm:$0xff] %v490_v5 }
 0x301   : > { %v484_v0 = vpop.permute.xlu1 %483 }
 0x302   : > { %v491_v1 = vmul.f32 %v484_v0, %v944_v8  ;;  %v492_v2 = vmul.f32 %v484_v0, %v946_v9 }
 0x304   : > { %499 = vst [vmem:[%s242_s29 + $0x30] sm:$0xff] %v491_v1  ;;  %500 = vst [vmem:[%s242_s29 + $0x38] sm:$0xff] %v492_v2 }
 0x305   : > { %730 = shalt.err (!%p727_p10)
}
 0x306   : > { %s731_s11 = scalar_lea.hbm %s987_s16, 1024  ;;  %s735_s26 = scalar_lea.hbm %s1037_s5, 2048 }
 0x307   : > { %p732_p0 = scmp.ne.s32.totalorder %s987_s16, %s731_s11  ;;  %p736_p1 = scmp.lt.s32.totalorder %s987_s16, %s1037_s5 }
 0x308   : > { %p737_p3 = scmp.lt.s32.totalorder %s735_s26, %s731_s11 }
 0x309   : > { %p733_p2 = pnand %p732_p0, %p1046_p12 }
 0x30a   : > { %p738_p6 = por %p737_p3, %p736_p1 }
 0x30b   : > { %p734_p9 = pneg %p733_p2 }
 0x30d   : > { %p739_p11 = pnand %p738_p6, %p734_p9 }
 0x30f   : > { %742 = shalt.err (!%p739_p11)
}
 0x310   : > { %s789_s14 = smov 256   ;;  %s790_s25 = smov 16  }
 0x311   : > { %633 = dma.vmem_to_hbm [thread:$0]  (%p1046_p12), %s982_s12, 1024, %s987_s16, %s502_s22, %s789_s14, %s789_s14, %s790_s25  }
 0x312 PF: > { %s530_s15 = sand.u32 1, %s769_s18   ;;  %p1047_p13 = scmp.ne.s32.totalorder %s1043_s6, 0 }
 0x313   : > { %p1048_p4 = scmp.ge.s32.totalorder %s781_s21, 2  ;;  %s531_s8 = scalar_lea.sflag [#allocation4], %s530_s15 }
 0x315   : > { %p640_p5 = pnand %p1048_p4, %p1047_p13 }
 0x317   : > { %p641_p7 = pneg %p640_p5 }
 0x319   : > { %764 = dma.done.wait (%p641_p7), %s531_s8, 1024  }
 0x31a   : > { %766 = vsyncadd (%p641_p7), %s531_s8, 4294966272  ;;  %p18_p8 = scmp.ge.s32.totalorder %s846_s24, 4   ;;  %s1049_s18 = smov %s773_s19 }
 0x31b   : > { %s1050_s19 = smov %s777_s20  ;;  %s1051_s20 = smov %s858_s27 }
 0x31c   : > { %s1052_s21 = smov %s846_s24  ;;  %20 = sbr.rel (!%p18_p8) target bundleno = 5 (0x5), region = 85 }
 0x321   :  { %536 = vsyncpa [#allocation3], 1 }
 0x322   :  { %538 = vsyncpa [#allocation3 + $0x1], 1 }
 0x323   :  { %539 = vsyncpa [#allocation4], 1 }
 0x324   :  { %541 = vsyncpa [#allocation4 + $0x1], 1 }

</bundles_post_ra>
